<compile_context>
chip_gen: v7x
topology: tpu7x:2x2x1
jax: 0.10.0
libtpu: 0.0.40
codegen_flags: <defaults>
</compile_context>

<pallas_src>
import jax
import jax.numpy as jnp
from jax.experimental import pallas as pl
from jax.experimental.pallas import tpu as pltpu

_LANE = 128
_SUBLANE = 8
_MIB = 1 << 20

# generation -> (target tile bytes, prefer-even-step-count, VMEM footprint cap)
_GEN_CONFIG = {
    "v7": (6 * _MIB, True, 44 * _MIB),
    "v6": (4 * _MIB, False, 100 * _MIB),
    "v5": (2 * _MIB, False, 100 * _MIB),
    "default": (2 * _MIB, False, 40 * _MIB),
}


def _cdiv(a, b):
    return -(-a // b)


def _round_up(a, b):
    return _cdiv(a, b) * b


def _tpu_generation():
    try:
        kind = jax.devices()[0].device_kind.lower()
    except Exception:
        return "default"
    if "v7" in kind or "7x" in kind:
        return "v7"
    if "v6" in kind:
        return "v6"
    if "v5" in kind:
        return "v5"
    return "default"


def _normalize_kernel(x_ref, scale_ref, bias_ref, o_ref):
    # x_ref / o_ref : VMEM tiles of shape (TM, cols)
    # scale_ref / bias_ref : VMEM tiles of shape (TM, 1), float32 (sublane bcast)
    x = x_ref[...].astype(jnp.float32)
    o_ref[...] = (x * scale_ref[...] + bias_ref[...]).astype(o_ref.dtype)


def _plan_layout(rows, cols, itemsize, target_bytes, prefer_even, vmem_cap):
    """Pick (k, tm): split each flattened row into k 128-aligned sub-rows and
    tile the resulting (rows*k, cols//k) matrix with row tiles of height tm."""
    total = rows * cols * itemsize
    slack = int(1.5 * target_bytes)

    if cols % _LANE == 0:
        m = cols // _LANE
        ks = sorted({d for i in range(1, int(m ** 0.5) + 1) if m % i == 0
                     for d in (i, m // i)})
    else:
        # TODO(synk): non-128-aligned planes keep full-width rows (masked lane
        # tail); a padded / element-indexed column tiling could avoid this.
        ks = [1]

    def plan_for(k):
        r, c = rows * k, cols // k
        rb = c * itemsize                          # bytes per flattened row
        if r <= _SUBLANE:
            tm = r
        else:
            budget_tm = (target_bytes // rb) // _SUBLANE * _SUBLANE
            tm = min(_round_up(r, _SUBLANE), max(_SUBLANE, budget_tm))
            n = _cdiv(r, tm)
            if prefer_even and r >= 2 * _SUBLANE and n % 2 == 1:
                # Look near the budget for an even step count (tile <= ~1.5x).
                hi = min(_round_up(r, _SUBLANE),
                         max(tm, (slack // rb) // _SUBLANE * _SUBLANE))
                for t in range(_SUBLANE, hi + 1, _SUBLANE):
                    if _cdiv(r, t) % 2 == 0:
                        tm = t
            # Keep the double-buffered in+out footprint under the VMEM cap.
            while tm > _SUBLANE and 4 * tm * rb + 4 * _MIB > vmem_cap:
                tm -= _SUBLANE
        n = _cdiv(r, tm)
        return k, tm, n, tm * rb

    def score(plan):
        k, tm, n, tile_bytes = plan
        fits = tile_bytes <= slack
        if prefer_even:
            sched_ok = (n % 2 == 0) or (n == 1 and total <= target_bytes)
        else:
            sched_ok = True
        # prefer: within budget, good step parity, largest tile, smallest split
        return (fits, sched_ok, tile_bytes, -k)

    k, tm, _, _ = max((plan_for(k) for k in ks), key=score)
    return k, tm


def normalize_by_channel_mean_std(x, mean, std):
    """Pallas equivalent of normalize_fn(tensor, mean, std) for NCHW input."""
    N, C, H, W = x.shape
    rows0 = N * C
    cols0 = H * W

    out_dtype = x.dtype if jnp.issubdtype(x.dtype, jnp.floating) else jnp.float32
    itemsize = max(jnp.dtype(x.dtype).itemsize, jnp.dtype(out_dtype).itemsize)

    target_bytes, prefer_even, vmem_cap = _GEN_CONFIG[_tpu_generation()]
    k, tm = _plan_layout(rows0, cols0, itemsize, target_bytes, prefer_even,
                         vmem_cap)

    rows = rows0 * k
    cols = cols0 // k

    # Lane-dense flatten: one (sub-)row per (n, c[, sub-plane]) slice.
    x2 = x.reshape(rows, cols)

    # Fold mean/std into per-row f32 scale/bias (scale = 1/std, bias = -mean/std).
    mean_f32 = jnp.asarray(mean, dtype=jnp.float32)
    std_f32 = jnp.asarray(std, dtype=jnp.float32)
    scale_c = 1.0 / std_f32                               # (C,)
    bias_c = -mean_f32 * scale_c                          # (C,)
    scale = jnp.repeat(jnp.tile(scale_c, N), k).reshape(rows, 1)   # (rows, 1)
    bias = jnp.repeat(jnp.tile(bias_c, N), k).reshape(rows, 1)     # (rows, 1)

    grid = (_cdiv(rows, tm),)

    tile_bytes = tm * cols * itemsize
    # in + out tiles (double-buffered) + (tm, 1) scale/bias blocks + slack.
    vmem_need = 4 * tile_bytes + 4 * tm * _LANE * 4 + 2 * _MIB
    vmem_limit = max(16 * _MIB, int(vmem_need))

    total_elems = rows * cols
    cost = pl.CostEstimate(
        flops=2 * total_elems,
        transcendentals=0,
        bytes_accessed=total_elems * (jnp.dtype(x.dtype).itemsize
                                      + jnp.dtype(out_dtype).itemsize)
        + 2 * rows * 4,
    )

    grid_spec = pltpu.PrefetchScalarGridSpec(
        num_scalar_prefetch=0,
        grid=grid,
        in_specs=[
            pl.BlockSpec((tm, cols), lambda i: (i, 0)),  # x
            pl.BlockSpec((tm, 1), lambda i: (i, 0)),     # scale
            pl.BlockSpec((tm, 1), lambda i: (i, 0)),     # bias
        ],
        out_specs=pl.BlockSpec((tm, cols), lambda i: (i, 0)),
    )

    out2 = pl.pallas_call(
        _normalize_kernel,
        out_shape=jax.ShapeDtypeStruct((rows, cols), out_dtype),
        grid_spec=grid_spec,
        compiler_params=pltpu.CompilerParams(
            dimension_semantics=("parallel",),
            vmem_limit_bytes=vmem_limit,
        ),
        cost_estimate=cost,
    )(x2, scale, bias)

    return out2.reshape(N, C, H, W)


if __name__ == "__main__":
    key = jax.random.PRNGKey(0)
    N, C, H, W = 2, 4, 16, 16

    x = jax.random.uniform(key, (N, C, H, W), dtype=jnp.float32)

    # Deterministic per-channel buffers (ImageNet-like values, extended to C=4).
    mean = jnp.array([0.485, 0.456, 0.406, 0.5], dtype=jnp.float32)
    std = jnp.array([0.229, 0.224, 0.225, 0.25], dtype=jnp.float32)

    out = jax.block_until_ready(normalize_by_channel_mean_std(x, mean, std))

    # Reference check (plain JAX broadcasting, mirrors the PyTorch semantics).
    ref = (x - mean[None, :, None, None]) / std[None, :, None, None]
    assert out.shape == (N, C, H, W)
    assert out.dtype == x.dtype
    assert jnp.allclose(out, ref, atol=1e-5, rtol=1e-5)

    print("KERNEL_OK")
</pallas_src>

<mosaic_0001>
module attributes {stable_mosaic.version = 11 : i64} {
  func.func @_normalize_kernel(%arg0: i32, %arg1: memref<8x256xf32, #tpu.memory_space<vmem>>, %arg2: memref<8x1xf32, #tpu.memory_space<vmem>>, %arg3: memref<8x1xf32, #tpu.memory_space<vmem>>, %arg4: memref<8x256xf32, #tpu.memory_space<vmem>>) attributes {dimension_semantics = [#tpu.dimension_semantics<parallel>], iteration_bounds = array<i64: 1>, scalar_prefetch = 0 : i64, scratch_operands = 0 : i64, tpu.core_type = #tpu.core_type<tc>, window_params = [{transform_indices = @transform_0, window_bounds = array<i64: 8, 256>}, {transform_indices = @transform_1, window_bounds = array<i64: 8, 1>}, {transform_indices = @transform_2, window_bounds = array<i64: 8, 1>}, {transform_indices = @transform_3, window_bounds = array<i64: 8, 256>}]} {
    %c0 = arith.constant 0 : index
    %c0_0 = arith.constant 0 : index
    %0 = vector.load %arg1[%c0, %c0_0] : memref<8x256xf32, #tpu.memory_space<vmem>>, vector<8x256xf32>
    %c0_1 = arith.constant 0 : index
    %c0_2 = arith.constant 0 : index
    %1 = vector.load %arg2[%c0_1, %c0_2] : memref<8x1xf32, #tpu.memory_space<vmem>>, vector<8x1xf32>
    %2 = vector.broadcast %1 : vector<8x1xf32> to vector<8x256xf32>
    %3 = arith.mulf %0, %2 : vector<8x256xf32>
    %c0_3 = arith.constant 0 : index
    %c0_4 = arith.constant 0 : index
    %4 = vector.load %arg3[%c0_3, %c0_4] : memref<8x1xf32, #tpu.memory_space<vmem>>, vector<8x1xf32>
    %5 = vector.broadcast %4 : vector<8x1xf32> to vector<8x256xf32>
    %6 = arith.addf %3, %5 : vector<8x256xf32>
    %c0_5 = arith.constant 0 : index
    %c0_6 = arith.constant 0 : index
    %7 = vector.load %arg4[%c0_5, %c0_6] : memref<8x256xf32, #tpu.memory_space<vmem>>, vector<8x256xf32>
    tpu.vector_store %arg4[%c0_5, %c0_6], %6 {strides = array<i32>} : memref<8x256xf32, #tpu.memory_space<vmem>>, vector<8x256xf32>,
    return
  }
  func.func @transform_0(%arg0: i32) -> (i32, i32) {
    %c0_i32 = arith.constant 0 : i32
    %c0_i32_0 = arith.constant 0 : i32
    return %arg0, %c0_i32 : i32, i32
  }
  func.func @transform_1(%arg0: i32) -> (i32, i32) {
    %c0_i32 = arith.constant 0 : i32
    %c0_i32_0 = arith.constant 0 : i32
    return %arg0, %c0_i32 : i32, i32
  }
  func.func @transform_2(%arg0: i32) -> (i32, i32) {
    %c0_i32 = arith.constant 0 : i32
    %c0_i32_0 = arith.constant 0 : i32
    return %arg0, %c0_i32 : i32, i32
  }
  func.func @transform_3(%arg0: i32) -> (i32, i32) {
    %c0_i32 = arith.constant 0 : i32
    %c0_i32_0 = arith.constant 0 : i32
    return %arg0, %c0_i32 : i32, i32
  }
}

</mosaic_0001>

<bundles_post_ra>
// kernel: tpu_custom_call.1
= control target key start
LH: loop header
LB: loop body
LE: loop exit
PB: predicated region body
PF: predicated region fallthrough
CT: control target
= control target key end

     0   :  { %s122_s0 = inlined_call_operand.vmem [shape: f32[8,256], index: 0, kind: input, shape index: {}]   ;;  %s123_s1 = inlined_call_operand.vmem [shape: f32[8,1], index: 1, kind: input, shape index: {}]   ;;  %s124_s2 = inlined_call_operand.vmem [shape: f32[8,1], index: 2, kind: input, shape index: {}]   ;;  %s125_s3 = inlined_call_operand.hbm [shape: f32[8,256], index: 3, kind: output, shape index: {}]  }
   0x1   :  { %v17_v0 = vld [vmem:[%s123_s1] sm:$0xff] }
   0x2   :  { %8 = vsyncpa [#allocation3], 0  ;;  %v76_v1 = vmov 0   ;;  %v25_v2 = vld [vmem:[%s124_s2] sm:$0xff]  ;;  %v16_v5 = vld [vmem:[%s122_s0 + $0x8] sm:$0xff]  ;;  %s77_s20 = smov [#allocation2]  }
   0x3   :  { %51 = vset.pattern.permute.xlu0 %v76_v1  ;;  %v15_v4 = vld [vmem:[%s122_s0] sm:$0xff]  ;;  %s41_s1 = sshll.u32 %s77_s20, 4  ;;  %s42_s1 = int_to_ptr.vmem [resolvable:$true] %s41_s1 }
   0x4   :  { %20 = vperm.xlu0 %51, %v17_v0   ;;  %s52_s2 = scalar_lea.vmem %s42_s1, 256  ;;  %p57_p1 = scmp.lt.s32.totalorder %s42_s1, %s42_s1 }
   0x5   :  { %p53_p0 = scmp.ne.s32.totalorder %s42_s1, %s52_s2  ;;  %p58_p2 = scmp.lt.s32.totalorder %s52_s2, %s52_s2 }
   0x7   :  { %p59_p3 = por %p58_p2, %p57_p1 }
   0x8   :  { %28 = vperm.xlu0 %51, %v25_v2  }
   0x9   :  { %p60_p4 = pnand %p59_p3, %p53_p0 }
  0x83   :  { %v21_v3 = vpop.permute.xlu0 %20 }
  0x84   :  { %v23_v6 = vmul.f32 %v21_v3, %v15_v4  ;;  %v24_v7 = vmul.f32 %v21_v3, %v16_v5 }
  0x87   :  { %v29_v8 = vpop.permute.xlu0 %28 }
  0x88   :  { %v31_v9 = vadd.f32 %v29_v8, %v23_v6  ;;  %v32_v10 = vadd.f32 %v29_v8, %v24_v7 }
  0x8a   :  { %33 = vst [vmem:[#allocation2] sm:$0xff] %v31_v9  ;;  %34 = vst [vmem:[#allocation2 + $0x8] sm:$0xff] %v32_v10 }
  0x8b   :  { %63 = shalt.err (!%p60_p4)
}
  0x8c   :  { %s64_s0 = scalar_lea.hbm %s125_s3, 256 }
  0x8d   :  { %p65_p5 = scmp.ne.s32.totalorder %s125_s3, %s64_s0  ;;  %p68_p6 = scmp.lt.u32.totalorder %s64_s0, %s125_s3 }
  0x8f   :  { %p70_p7 = pnand %p68_p6, %p65_p5 }
  0x91   :  { %73 = shalt.err (!%p70_p7)
}
  0x92   :  { %44 = dma.vmem_to_hbm [thread:$0]  %s42_s1, 256, %s125_s3, [#allocation3]  }
  0x93   :  { %74 = dma.done.wait [#allocation3], 256  }
  0x94   :  { %75 = vsyncadd [#allocation3], 4294967040 }
  0x95   :  { %48 = vsyncpa [#allocation3], 1 }

</bundles_post_ra>
